<compile_context>
chip_gen: v5e
topology: v5e:2x2
jax: 0.10.0
libtpu: 0.0.40
codegen_flags: <defaults>
</compile_context>

<pallas_src>
import functools

import jax
import jax.numpy as jnp
from jax import lax
from jax.experimental import pallas as pl
from jax.experimental.pallas import tpu as pltpu

# hp.* hyperparameters (embedding_dim must equal input_size for emb -> LSTM to typecheck)
EMB_DIM = 32      # hp.embedding_dim == hp.input_size
HIDDEN = 32       # hp.hidden_size
FC_DIM = 128
V_SIZE = 50       # vocabulary size
V_PAD = 128       # lane-dense padded logits width (multiple of 128)
V_ROWS = 64       # proj_table rows padded 50 -> 64 (aligned K for the one-hot matmul)


def rnn_m2o_fused_kernel(tok_ref,       # VMEM (T*B, 1) int32  time-major token ids (row = t*B + b)
                         proj_ref,      # VMEM (V_ROWS, 4H) f32  emb @ W_ih^T + (b_ih+b_hh), zero-padded rows
                         whh_ref,       # VMEM (H, 4H) bf16      W_hh^T
                         w1_ref,        # VMEM (H, FC) bf16      fc.weight^T
                         b1_ref,        # VMEM (1, FC) f32       fc.bias
                         w2_ref,        # VMEM (FC, V_PAD) bf16  fc2.weight^T, zero-padded on N
                         b2_ref,        # VMEM (1, V_PAD) f32    fc2.bias, zero-padded
                         out_ref,       # VMEM (B, V_PAD) f32
                         *, B, T, H):
    # ---- Pre-loop: fused embedding + input projection for ALL time steps -----
    # one_hot(tok) @ proj_pad == gather of proj rows; one MXU matmul, off the
    # serial critical path (overlaps with loop warm-up).  Tokens outside
    # [0, V_SIZE) select an all-zero row instead of reading out of bounds.
    tok = tok_ref[...]                                              # (T*B, 1) int32
    iota = lax.broadcasted_iota(jnp.int32, (T * B, V_ROWS), 1)      # (T*B, V_ROWS)
    one_hot = (iota == tok).astype(jnp.float32)
    gx_all = jnp.dot(one_hot, proj_ref[...],
                     preferred_element_type=jnp.float32)            # (T*B, 4H)

    whh = whh_ref[...]                                              # bf16, VMEM-resident

    h = jnp.zeros((B, H), jnp.float32)
    c = jnp.zeros((B, H), jnp.float32)

    # ---- Serial recurrence (T=8, fully unrolled; static slices of gx_all) ----
    # Static Python unroll keeps the gx_all slice offsets compile-time constants.
    for t in range(T):
        gx = gx_all[t * B:(t + 1) * B, :]                           # (B, 4H) static slice
        gates = gx + jnp.dot(h.astype(jnp.bfloat16), whh,
                             preferred_element_type=jnp.float32)    # single-pass bf16 MXU

        # Whole-vreg EUP passes over the full 128-lane gates, then 32-lane views.
        sg = jax.nn.sigmoid(gates)
        tg = jnp.tanh(gates)
        i = sg[:, 0 * H:1 * H]
        f = sg[:, 1 * H:2 * H]
        g = tg[:, 2 * H:3 * H]
        o = sg[:, 3 * H:4 * H]

        c = f * c + i * g
        h = o * jnp.tanh(c)                                         # h_last after final t

    # ---- Head: fc -> ReLU -> dropout(eval: identity) -> fc2 ------------------
    z = jnp.dot(h.astype(jnp.bfloat16), w1_ref[...],
                preferred_element_type=jnp.float32) + b1_ref[...]
    z = jnp.maximum(z, 0.0)
    # TODO(synk): nn.Dropout(p=0.5) and the LSTM's inter-layer dropout are
    # identity in eval/inference mode (and with num_layers=1); no-op here.
    out_ref[...] = (jnp.dot(z.astype(jnp.bfloat16), w2_ref[...],
                            preferred_element_type=jnp.float32) + b2_ref[...])


def rnn_m2o_forward(token_ids, fused_params):
    proj_pad, whh_t, w1_t, b1, w2_t_pad, b2_pad = fused_params
    B, T = token_ids.shape
    H = whh_t.shape[0]

    # Time-major flatten so each time step's gx rows are contiguous: row = t*B + b.
    tok_tm = token_ids.T.reshape(T * B, 1).astype(jnp.int32)

    out_pad = pl.pallas_call(
        functools.partial(rnn_m2o_fused_kernel, B=B, T=T, H=H),
        out_shape=jax.ShapeDtypeStruct((B, V_PAD), jnp.float32),
        in_specs=[
            pl.BlockSpec(memory_space=pltpu.MemorySpace.VMEM),   # token ids (time-major)
            pl.BlockSpec(memory_space=pltpu.MemorySpace.VMEM),   # proj table (padded rows)
            pl.BlockSpec(memory_space=pltpu.MemorySpace.VMEM),   # W_hh^T   (bf16)
            pl.BlockSpec(memory_space=pltpu.MemorySpace.VMEM),   # fc  W^T  (bf16)
            pl.BlockSpec(memory_space=pltpu.MemorySpace.VMEM),   # fc  b
            pl.BlockSpec(memory_space=pltpu.MemorySpace.VMEM),   # fc2 W^T  (bf16, lane-padded)
            pl.BlockSpec(memory_space=pltpu.MemorySpace.VMEM),   # fc2 b    (lane-padded)
        ],
        out_specs=pl.BlockSpec(memory_space=pltpu.MemorySpace.VMEM),
    )(tok_tm, proj_pad, whh_t, w1_t, b1, w2_t_pad, b2_pad)

    return out_pad[:, :V_SIZE]                                   # strip lane padding


def init_params(key):
    """Deterministic synthetic parameters matching the PyTorch module's shapes."""
    ks = jax.random.split(key, 9)
    s = 0.1
    emb_table = s * jax.random.normal(ks[0], (V_SIZE, EMB_DIM), jnp.float32)
    w_ih = s * jax.random.normal(ks[1], (4 * HIDDEN, EMB_DIM), jnp.float32)
    w_hh = s * jax.random.normal(ks[2], (4 * HIDDEN, HIDDEN), jnp.float32)
    b_ih = s * jax.random.normal(ks[3], (4 * HIDDEN,), jnp.float32)
    b_hh = s * jax.random.normal(ks[4], (4 * HIDDEN,), jnp.float32)
    w1 = s * jax.random.normal(ks[5], (FC_DIM, HIDDEN), jnp.float32)    # fc.weight
    b1 = s * jax.random.normal(ks[6], (FC_DIM,), jnp.float32)
    w2 = s * jax.random.normal(ks[7], (V_SIZE, FC_DIM), jnp.float32)    # fc2.weight
    b2 = s * jax.random.normal(ks[8], (V_SIZE,), jnp.float32)
    raw = (emb_table, w_ih, w_hh, b_ih, b_hh, w1, b1, w2, b2)

    # One-time algebraic folding / layout prep (outside the per-forward path):
    proj_table = emb_table @ w_ih.T + (b_ih + b_hh)[None, :]            # (V, 4H) f32
    proj_pad = jnp.zeros((V_ROWS, 4 * HIDDEN), jnp.float32).at[:V_SIZE].set(proj_table)
    whh_t = jnp.asarray(w_hh.T).astype(jnp.bfloat16)                    # (H, 4H) bf16
    w1_t = jnp.asarray(w1.T).astype(jnp.bfloat16)                       # (H, 128) bf16
    b1_r = b1[None, :]                                                  # (1, 128) f32
    w2_t_pad = (jnp.zeros((FC_DIM, V_PAD), jnp.float32)
                .at[:, :V_SIZE].set(w2.T).astype(jnp.bfloat16))         # (128, 128) bf16
    b2_pad = jnp.zeros((1, V_PAD), jnp.float32).at[:, :V_SIZE].set(b2)  # (1, 128) f32
    fused = (proj_pad, whh_t, w1_t, b1_r, w2_t_pad, b2_pad)
    return fused, raw


def reference_forward(token_ids, raw):
    """Pure-JAX f32 reference with the exact PyTorch semantics (sanity check)."""
    emb_table, w_ih, w_hh, b_ih, b_hh, w1, b1, w2, b2 = raw
    B = token_ids.shape[0]
    H = w_hh.shape[1]
    emb = emb_table[token_ids]                                   # (B, T, E)

    def step(carry, x_t):
        h, c = carry
        gates = x_t @ w_ih.T + b_ih + h @ w_hh.T + b_hh
        i = jax.nn.sigmoid(gates[:, 0 * H:1 * H])
        f = jax.nn.sigmoid(gates[:, 1 * H:2 * H])
        g = jnp.tanh(gates[:, 2 * H:3 * H])
        o = jax.nn.sigmoid(gates[:, 3 * H:4 * H])
        c = f * c + i * g
        h = o * jnp.tanh(c)
        return (h, c), None

    (h_last, _), _ = lax.scan(step,
                              (jnp.zeros((B, H), jnp.float32),
                               jnp.zeros((B, H), jnp.float32)),
                              jnp.transpose(emb, (1, 0, 2)))
    z = jnp.maximum(h_last @ w1.T + b1, 0.0)
    return z @ w2.T + b2


if __name__ == "__main__":
    B, T = 2, 8
    key = jax.random.PRNGKey(0)
    pkey, ikey = jax.random.split(key)
    fused_params, raw_params = init_params(pkey)
    token_ids = jax.random.randint(ikey, (B, T), 0, V_SIZE, dtype=jnp.int32)

    out = rnn_m2o_forward(token_ids, fused_params)
    jax.block_until_ready(out)
    assert out.shape == (B, V_SIZE) and out.dtype == jnp.float32

    ref = reference_forward(token_ids, raw_params)
    max_err = float(jnp.max(jnp.abs(out - ref)))
    assert max_err < 2e-3, f"mismatch vs pure-JAX reference: {max_err}"
    print("KERNEL_OK")
</pallas_src>

<mosaic_0001>
module attributes {stable_mosaic.version = 11 : i64} {
  func.func @rnn_m2o_fused_kernel(%arg0: memref<16x1xi32, #tpu.memory_space<vmem>>, %arg1: memref<64x128xf32, #tpu.memory_space<vmem>>, %arg2: memref<32x128xbf16, #tpu.memory_space<vmem>>, %arg3: memref<32x128xbf16, #tpu.memory_space<vmem>>, %arg4: memref<1x128xf32, #tpu.memory_space<vmem>>, %arg5: memref<128x128xbf16, #tpu.memory_space<vmem>>, %arg6: memref<1x128xf32, #tpu.memory_space<vmem>>, %arg7: memref<2x128xf32, #tpu.memory_space<vmem>>) attributes {dimension_semantics = [], scalar_prefetch = 0 : i64, scratch_operands = 0 : i64, tpu.core_type = #tpu.core_type<tc>} {
    %c0 = arith.constant 0 : index
    %c0_0 = arith.constant 0 : index
    %0 = vector.load %arg0[%c0, %c0_0] : memref<16x1xi32, #tpu.memory_space<vmem>>, vector<16x1xi32>
    %1 = tpu.iota {dimensions = array<i32: 1>} : vector<16x64xi32>
    %2 = vector.broadcast %0 : vector<16x1xi32> to vector<16x64xi32>
    %3 = arith.cmpi eq, %1, %2 : vector<16x64xi32>
    %4 = arith.extui %3 : vector<16x64xi1> to vector<16x64xi32>
    %5 = arith.sitofp %4 : vector<16x64xi32> to vector<16x64xf32>
    %c0_1 = arith.constant 0 : index
    %c0_2 = arith.constant 0 : index
    %6 = vector.load %arg1[%c0_1, %c0_2] : memref<64x128xf32, #tpu.memory_space<vmem>>, vector<64x128xf32>
    %cst = arith.constant dense<0.000000e+00> : vector<16x128xf32>
    %7 = tpu.matmul %5, %6, %cst {dimension_numbers = #tpu.dot_dimension_numbers<[1], [0], [0], [1], [0, 0, 1, 1], [], []>} : vector<16x64xf32>, vector<64x128xf32>, vector<16x128xf32> -> vector<16x128xf32>
    %c0_3 = arith.constant 0 : index
    %c0_4 = arith.constant 0 : index
    %8 = vector.load %arg2[%c0_3, %c0_4] : memref<32x128xbf16, #tpu.memory_space<vmem>>, vector<32x128xbf16>
    %cst_5 = arith.constant 0.000000e+00 : f32
    %9 = vector.broadcast %cst_5 : f32 to vector<2x32xf32>
    %cst_6 = arith.constant 0.000000e+00 : f32
    %10 = vector.broadcast %cst_6 : f32 to vector<2x32xf32>
    %11 = vector.extract_strided_slice %7 {offsets = [0, 0], sizes = [2, 128], strides = [1, 1]} : vector<16x128xf32> to vector<2x128xf32>
    %12 = arith.truncf %9 : vector<2x32xf32> to vector<2x32xbf16>
    %cst_7 = arith.constant dense<0.000000e+00> : vector<2x128xf32>
    %13 = tpu.matmul %12, %8, %cst_7 {dimension_numbers = #tpu.dot_dimension_numbers<[1], [0], [0], [1], [0, 0, 1, 1], [], []>} : vector<2x32xbf16>, vector<32x128xbf16>, vector<2x128xf32> -> vector<2x128xf32>
    %14 = arith.addf %11, %13 : vector<2x128xf32>
    %15 = arith.negf %14 : vector<2x128xf32>
    %16 = math.exp %15 : vector<2x128xf32>
    %cst_8 = arith.constant 1.000000e+00 : f32
    %17 = vector.broadcast %cst_8 : f32 to vector<2x128xf32>
    %18 = arith.addf %17, %16 : vector<2x128xf32>
    %19 = arith.divf %17, %18 : vector<2x128xf32>
    %20 = math.tanh %14 : vector<2x128xf32>
    %21 = vector.extract_strided_slice %19 {offsets = [0, 0], sizes = [2, 32], strides = [1, 1]} : vector<2x128xf32> to vector<2x32xf32>
    %22 = vector.extract_strided_slice %19 {offsets = [0, 32], sizes = [2, 32], strides = [1, 1]} : vector<2x128xf32> to vector<2x32xf32>
    %23 = vector.extract_strided_slice %20 {offsets = [0, 64], sizes = [2, 32], strides = [1, 1]} : vector<2x128xf32> to vector<2x32xf32>
    %24 = vector.extract_strided_slice %19 {offsets = [0, 96], sizes = [2, 32], strides = [1, 1]} : vector<2x128xf32> to vector<2x32xf32>
    %25 = arith.mulf %22, %10 : vector<2x32xf32>
    %26 = arith.mulf %21, %23 : vector<2x32xf32>
    %27 = arith.addf %25, %26 : vector<2x32xf32>
    %28 = math.tanh %27 : vector<2x32xf32>
    %29 = arith.mulf %24, %28 : vector<2x32xf32>
    %30 = vector.extract_strided_slice %7 {offsets = [2, 0], sizes = [2, 128], strides = [1, 1]} : vector<16x128xf32> to vector<2x128xf32>
    %31 = arith.truncf %29 : vector<2x32xf32> to vector<2x32xbf16>
    %cst_9 = arith.constant dense<0.000000e+00> : vector<2x128xf32>
    %32 = tpu.matmul %31, %8, %cst_9 {dimension_numbers = #tpu.dot_dimension_numbers<[1], [0], [0], [1], [0, 0, 1, 1], [], []>} : vector<2x32xbf16>, vector<32x128xbf16>, vector<2x128xf32> -> vector<2x128xf32>
    %33 = arith.addf %30, %32 : vector<2x128xf32>
    %34 = arith.negf %33 : vector<2x128xf32>
    %35 = math.exp %34 : vector<2x128xf32>
    %cst_10 = arith.constant 1.000000e+00 : f32
    %36 = vector.broadcast %cst_10 : f32 to vector<2x128xf32>
    %37 = arith.addf %36, %35 : vector<2x128xf32>
    %38 = arith.divf %36, %37 : vector<2x128xf32>
    %39 = math.tanh %33 : vector<2x128xf32>
    %40 = vector.extract_strided_slice %38 {offsets = [0, 0], sizes = [2, 32], strides = [1, 1]} : vector<2x128xf32> to vector<2x32xf32>
    %41 = vector.extract_strided_slice %38 {offsets = [0, 32], sizes = [2, 32], strides = [1, 1]} : vector<2x128xf32> to vector<2x32xf32>
    %42 = vector.extract_strided_slice %39 {offsets = [0, 64], sizes = [2, 32], strides = [1, 1]} : vector<2x128xf32> to vector<2x32xf32>
    %43 = vector.extract_strided_slice %38 {offsets = [0, 96], sizes = [2, 32], strides = [1, 1]} : vector<2x128xf32> to vector<2x32xf32>
    %44 = arith.mulf %41, %27 : vector<2x32xf32>
    %45 = arith.mulf %40, %42 : vector<2x32xf32>
    %46 = arith.addf %44, %45 : vector<2x32xf32>
    %47 = math.tanh %46 : vector<2x32xf32>
    %48 = arith.mulf %43, %47 : vector<2x32xf32>
    %49 = vector.extract_strided_slice %7 {offsets = [4, 0], sizes = [2, 128], strides = [1, 1]} : vector<16x128xf32> to vector<2x128xf32>
    %50 = arith.truncf %48 : vector<2x32xf32> to vector<2x32xbf16>
    %cst_11 = arith.constant dense<0.000000e+00> : vector<2x128xf32>
    %51 = tpu.matmul %50, %8, %cst_11 {dimension_numbers = #tpu.dot_dimension_numbers<[1], [0], [0], [1], [0, 0, 1, 1], [], []>} : vector<2x32xbf16>, vector<32x128xbf16>, vector<2x128xf32> -> vector<2x128xf32>
    %52 = arith.addf %49, %51 : vector<2x128xf32>
    %53 = arith.negf %52 : vector<2x128xf32>
    %54 = math.exp %53 : vector<2x128xf32>
    %cst_12 = arith.constant 1.000000e+00 : f32
    %55 = vector.broadcast %cst_12 : f32 to vector<2x128xf32>
    %56 = arith.addf %55, %54 : vector<2x128xf32>
    %57 = arith.divf %55, %56 : vector<2x128xf32>
    %58 = math.tanh %52 : vector<2x128xf32>
    %59 = vector.extract_strided_slice %57 {offsets = [0, 0], sizes = [2, 32], strides = [1, 1]} : vector<2x128xf32> to vector<2x32xf32>
    %60 = vector.extract_strided_slice %57 {offsets = [0, 32], sizes = [2, 32], strides = [1, 1]} : vector<2x128xf32> to vector<2x32xf32>
    %61 = vector.extract_strided_slice %58 {offsets = [0, 64], sizes = [2, 32], strides = [1, 1]} : vector<2x128xf32> to vector<2x32xf32>
    %62 = vector.extract_strided_slice %57 {offsets = [0, 96], sizes = [2, 32], strides = [1, 1]} : vector<2x128xf32> to vector<2x32xf32>
    %63 = arith.mulf %60, %46 : vector<2x32xf32>
    %64 = arith.mulf %59, %61 : vector<2x32xf32>
    %65 = arith.addf %63, %64 : vector<2x32xf32>
    %66 = math.tanh %65 : vector<2x32xf32>
    %67 = arith.mulf %62, %66 : vector<2x32xf32>
    %68 = vector.extract_strided_slice %7 {offsets = [6, 0], sizes = [2, 128], strides = [1, 1]} : vector<16x128xf32> to vector<2x128xf32>
    %69 = arith.truncf %67 : vector<2x32xf32> to vector<2x32xbf16>
    %cst_13 = arith.constant dense<0.000000e+00> : vector<2x128xf32>
    %70 = tpu.matmul %69, %8, %cst_13 {dimension_numbers = #tpu.dot_dimension_numbers<[1], [0], [0], [1], [0, 0, 1, 1], [], []>} : vector<2x32xbf16>, vector<32x128xbf16>, vector<2x128xf32> -> vector<2x128xf32>
    %71 = arith.addf %68, %70 : vector<2x128xf32>
    %72 = arith.negf %71 : vector<2x128xf32>
    %73 = math.exp %72 : vector<2x128xf32>
    %cst_14 = arith.constant 1.000000e+00 : f32
    %74 = vector.broadcast %cst_14 : f32 to vector<2x128xf32>
    %75 = arith.addf %74, %73 : vector<2x128xf32>
    %76 = arith.divf %74, %75 : vector<2x128xf32>
    %77 = math.tanh %71 : vector<2x128xf32>
    %78 = vector.extract_strided_slice %76 {offsets = [0, 0], sizes = [2, 32], strides = [1, 1]} : vector<2x128xf32> to vector<2x32xf32>
    %79 = vector.extract_strided_slice %76 {offsets = [0, 32], sizes = [2, 32], strides = [1, 1]} : vector<2x128xf32> to vector<2x32xf32>
    %80 = vector.extract_strided_slice %77 {offsets = [0, 64], sizes = [2, 32], strides = [1, 1]} : vector<2x128xf32> to vector<2x32xf32>
    %81 = vector.extract_strided_slice %76 {offsets = [0, 96], sizes = [2, 32], strides = [1, 1]} : vector<2x128xf32> to vector<2x32xf32>
    %82 = arith.mulf %79, %65 : vector<2x32xf32>
    %83 = arith.mulf %78, %80 : vector<2x32xf32>
    %84 = arith.addf %82, %83 : vector<2x32xf32>
    %85 = math.tanh %84 : vector<2x32xf32>
    %86 = arith.mulf %81, %85 : vector<2x32xf32>
    %87 = vector.extract_strided_slice %7 {offsets = [8, 0], sizes = [2, 128], strides = [1, 1]} : vector<16x128xf32> to vector<2x128xf32>
    %88 = arith.truncf %86 : vector<2x32xf32> to vector<2x32xbf16>
    %cst_15 = arith.constant dense<0.000000e+00> : vector<2x128xf32>
    %89 = tpu.matmul %88, %8, %cst_15 {dimension_numbers = #tpu.dot_dimension_numbers<[1], [0], [0], [1], [0, 0, 1, 1], [], []>} : vector<2x32xbf16>, vector<32x128xbf16>, vector<2x128xf32> -> vector<2x128xf32>
    %90 = arith.addf %87, %89 : vector<2x128xf32>
    %91 = arith.negf %90 : vector<2x128xf32>
    %92 = math.exp %91 : vector<2x128xf32>
    %cst_16 = arith.constant 1.000000e+00 : f32
    %93 = vector.broadcast %cst_16 : f32 to vector<2x128xf32>
    %94 = arith.addf %93, %92 : vector<2x128xf32>
    %95 = arith.divf %93, %94 : vector<2x128xf32>
    %96 = math.tanh %90 : vector<2x128xf32>
    %97 = vector.extract_strided_slice %95 {offsets = [0, 0], sizes = [2, 32], strides = [1, 1]} : vector<2x128xf32> to vector<2x32xf32>
    %98 = vector.extract_strided_slice %95 {offsets = [0, 32], sizes = [2, 32], strides = [1, 1]} : vector<2x128xf32> to vector<2x32xf32>
    %99 = vector.extract_strided_slice %96 {offsets = [0, 64], sizes = [2, 32], strides = [1, 1]} : vector<2x128xf32> to vector<2x32xf32>
    %100 = vector.extract_strided_slice %95 {offsets = [0, 96], sizes = [2, 32], strides = [1, 1]} : vector<2x128xf32> to vector<2x32xf32>
    %101 = arith.mulf %98, %84 : vector<2x32xf32>
    %102 = arith.mulf %97, %99 : vector<2x32xf32>
    %103 = arith.addf %101, %102 : vector<2x32xf32>
    %104 = math.tanh %103 : vector<2x32xf32>
    %105 = arith.mulf %100, %104 : vector<2x32xf32>
    %106 = vector.extract_strided_slice %7 {offsets = [10, 0], sizes = [2, 128], strides = [1, 1]} : vector<16x128xf32> to vector<2x128xf32>
    %107 = arith.truncf %105 : vector<2x32xf32> to vector<2x32xbf16>
    %cst_17 = arith.constant dense<0.000000e+00> : vector<2x128xf32>
    %108 = tpu.matmul %107, %8, %cst_17 {dimension_numbers = #tpu.dot_dimension_numbers<[1], [0], [0], [1], [0, 0, 1, 1], [], []>} : vector<2x32xbf16>, vector<32x128xbf16>, vector<2x128xf32> -> vector<2x128xf32>
    %109 = arith.addf %106, %108 : vector<2x128xf32>
    %110 = arith.negf %109 : vector<2x128xf32>
    %111 = math.exp %110 : vector<2x128xf32>
    %cst_18 = arith.constant 1.000000e+00 : f32
    %112 = vector.broadcast %cst_18 : f32 to vector<2x128xf32>
    %113 = arith.addf %112, %111 : vector<2x128xf32>
    %114 = arith.divf %112, %113 : vector<2x128xf32>
    %115 = math.tanh %109 : vector<2x128xf32>
    %116 = vector.extract_strided_slice %114 {offsets = [0, 0], sizes = [2, 32], strides = [1, 1]} : vector<2x128xf32> to vector<2x32xf32>
    %117 = vector.extract_strided_slice %114 {offsets = [0, 32], sizes = [2, 32], strides = [1, 1]} : vector<2x128xf32> to vector<2x32xf32>
    %118 = vector.extract_strided_slice %115 {offsets = [0, 64], sizes = [2, 32], strides = [1, 1]} : vector<2x128xf32> to vector<2x32xf32>
    %119 = vector.extract_strided_slice %114 {offsets = [0, 96], sizes = [2, 32], strides = [1, 1]} : vector<2x128xf32> to vector<2x32xf32>
    %120 = arith.mulf %117, %103 : vector<2x32xf32>
    %121 = arith.mulf %116, %118 : vector<2x32xf32>
    %122 = arith.addf %120, %121 : vector<2x32xf32>
    %123 = math.tanh %122 : vector<2x32xf32>
    %124 = arith.mulf %119, %123 : vector<2x32xf32>
    %125 = vector.extract_strided_slice %7 {offsets = [12, 0], sizes = [2, 128], strides = [1, 1]} : vector<16x128xf32> to vector<2x128xf32>
    %126 = arith.truncf %124 : vector<2x32xf32> to vector<2x32xbf16>
    %cst_19 = arith.constant dense<0.000000e+00> : vector<2x128xf32>
    %127 = tpu.matmul %126, %8, %cst_19 {dimension_numbers = #tpu.dot_dimension_numbers<[1], [0], [0], [1], [0, 0, 1, 1], [], []>} : vector<2x32xbf16>, vector<32x128xbf16>, vector<2x128xf32> -> vector<2x128xf32>
    %128 = arith.addf %125, %127 : vector<2x128xf32>
    %129 = arith.negf %128 : vector<2x128xf32>
    %130 = math.exp %129 : vector<2x128xf32>
    %cst_20 = arith.constant 1.000000e+00 : f32
    %131 = vector.broadcast %cst_20 : f32 to vector<2x128xf32>
    %132 = arith.addf %131, %130 : vector<2x128xf32>
    %133 = arith.divf %131, %132 : vector<2x128xf32>
    %134 = math.tanh %128 : vector<2x128xf32>
    %135 = vector.extract_strided_slice %133 {offsets = [0, 0], sizes = [2, 32], strides = [1, 1]} : vector<2x128xf32> to vector<2x32xf32>
    %136 = vector.extract_strided_slice %133 {offsets = [0, 32], sizes = [2, 32], strides = [1, 1]} : vector<2x128xf32> to vector<2x32xf32>
    %137 = vector.extract_strided_slice %134 {offsets = [0, 64], sizes = [2, 32], strides = [1, 1]} : vector<2x128xf32> to vector<2x32xf32>
    %138 = vector.extract_strided_slice %133 {offsets = [0, 96], sizes = [2, 32], strides = [1, 1]} : vector<2x128xf32> to vector<2x32xf32>
    %139 = arith.mulf %136, %122 : vector<2x32xf32>
    %140 = arith.mulf %135, %137 : vector<2x32xf32>
    %141 = arith.addf %139, %140 : vector<2x32xf32>
    %142 = math.tanh %141 : vector<2x32xf32>
    %143 = arith.mulf %138, %142 : vector<2x32xf32>
    %144 = vector.extract_strided_slice %7 {offsets = [14, 0], sizes = [2, 128], strides = [1, 1]} : vector<16x128xf32> to vector<2x128xf32>
    %145 = arith.truncf %143 : vector<2x32xf32> to vector<2x32xbf16>
    %cst_21 = arith.constant dense<0.000000e+00> : vector<2x128xf32>
    %146 = tpu.matmul %145, %8, %cst_21 {dimension_numbers = #tpu.dot_dimension_numbers<[1], [0], [0], [1], [0, 0, 1, 1], [], []>} : vector<2x32xbf16>, vector<32x128xbf16>, vector<2x128xf32> -> vector<2x128xf32>
    %147 = arith.addf %144, %146 : vector<2x128xf32>
    %148 = arith.negf %147 : vector<2x128xf32>
    %149 = math.exp %148 : vector<2x128xf32>
    %cst_22 = arith.constant 1.000000e+00 : f32
    %150 = vector.broadcast %cst_22 : f32 to vector<2x128xf32>
    %151 = arith.addf %150, %149 : vector<2x128xf32>
    %152 = arith.divf %150, %151 : vector<2x128xf32>
    %153 = math.tanh %147 : vector<2x128xf32>
    %154 = vector.extract_strided_slice %152 {offsets = [0, 0], sizes = [2, 32], strides = [1, 1]} : vector<2x128xf32> to vector<2x32xf32>
    %155 = vector.extract_strided_slice %152 {offsets = [0, 32], sizes = [2, 32], strides = [1, 1]} : vector<2x128xf32> to vector<2x32xf32>
    %156 = vector.extract_strided_slice %153 {offsets = [0, 64], sizes = [2, 32], strides = [1, 1]} : vector<2x128xf32> to vector<2x32xf32>
    %157 = vector.extract_strided_slice %152 {offsets = [0, 96], sizes = [2, 32], strides = [1, 1]} : vector<2x128xf32> to vector<2x32xf32>
    %158 = arith.mulf %155, %141 : vector<2x32xf32>
    %159 = arith.mulf %154, %156 : vector<2x32xf32>
    %160 = arith.addf %158, %159 : vector<2x32xf32>
    %161 = math.tanh %160 : vector<2x32xf32>
    %162 = arith.mulf %157, %161 : vector<2x32xf32>
    %163 = arith.truncf %162 : vector<2x32xf32> to vector<2x32xbf16>
    %c0_23 = arith.constant 0 : index
    %c0_24 = arith.constant 0 : index
    %164 = vector.load %arg3[%c0_23, %c0_24] : memref<32x128xbf16, #tpu.memory_space<vmem>>, vector<32x128xbf16>
    %cst_25 = arith.constant dense<0.000000e+00> : vector<2x128xf32>
    %165 = tpu.matmul %163, %164, %cst_25 {dimension_numbers = #tpu.dot_dimension_numbers<[1], [0], [0], [1], [0, 0, 1, 1], [], []>} : vector<2x32xbf16>, vector<32x128xbf16>, vector<2x128xf32> -> vector<2x128xf32>
    %c0_26 = arith.constant 0 : index
    %c0_27 = arith.constant 0 : index
    %166 = vector.load %arg4[%c0_26, %c0_27] : memref<1x128xf32, #tpu.memory_space<vmem>>, vector<1x128xf32>
    %167 = vector.broadcast %166 : vector<1x128xf32> to vector<2x128xf32>
    %168 = arith.addf %165, %167 : vector<2x128xf32>
    %cst_28 = arith.constant 0.000000e+00 : f32
    %169 = vector.broadcast %cst_28 : f32 to vector<2x128xf32>
    %170 = arith.maximumf %168, %169 : vector<2x128xf32>
    %171 = arith.truncf %170 : vector<2x128xf32> to vector<2x128xbf16>
    %c0_29 = arith.constant 0 : index
    %c0_30 = arith.constant 0 : index
    %172 = vector.load %arg5[%c0_29, %c0_30] : memref<128x128xbf16, #tpu.memory_space<vmem>>, vector<128x128xbf16>
    %cst_31 = arith.constant dense<0.000000e+00> : vector<2x128xf32>
    %173 = tpu.matmul %171, %172, %cst_31 {dimension_numbers = #tpu.dot_dimension_numbers<[1], [0], [0], [1], [0, 0, 1, 1], [], []>} : vector<2x128xbf16>, vector<128x128xbf16>, vector<2x128xf32> -> vector<2x128xf32>
    %c0_32 = arith.constant 0 : index
    %c0_33 = arith.constant 0 : index
    %174 = vector.load %arg6[%c0_32, %c0_33] : memref<1x128xf32, #tpu.memory_space<vmem>>, vector<1x128xf32>
    %175 = vector.broadcast %174 : vector<1x128xf32> to vector<2x128xf32>
    %176 = arith.addf %173, %175 : vector<2x128xf32>
    %c0_34 = arith.constant 0 : index
    %c0_35 = arith.constant 0 : index
    %177 = vector.load %arg7[%c0_34, %c0_35] : memref<2x128xf32, #tpu.memory_space<vmem>>, vector<2x128xf32>
    tpu.vector_store %arg7[%c0_34, %c0_35], %176 {strides = array<i32>} : memref<2x128xf32, #tpu.memory_space<vmem>>, vector<2x128xf32>,
    return
  }
}

</mosaic_0001>

<bundles_post_ra>
// kernel: tpu_custom_call.1
= control target key start
LH: loop header
LB: loop body
LE: loop exit
PB: predicated region body
PF: predicated region fallthrough
CT: control target
= control target key end

     0   :  { %12 = vsyncpa [#allocation3], 0  ;;  %s1199_s0 = inlined_call_operand.vmem [shape: s32[16,1], index: 0, kind: input, shape index: {}]   ;;  %s1200_s1 = inlined_call_operand.hbm [shape: f32[64,128], index: 1, kind: input, shape index: {}]   ;;  %s1201_s2 = inlined_call_operand.vmem [shape: bf16[32,128], index: 2, kind: input, shape index: {}]   ;;  %s1202_s3 = inlined_call_operand.hbm [shape: bf16[32,128], index: 3, kind: input, shape index: {}]   ;;  %s1203_s4 = inlined_call_operand.vmem [shape: f32[1,128], index: 4, kind: input, shape index: {}]   ;;  %s1204_s5 = inlined_call_operand.hbm [shape: bf16[128,128], index: 5, kind: input, shape index: {}]   ;;  %s1205_s6 = inlined_call_operand.vmem [shape: f32[1,128], index: 6, kind: input, shape index: {}]   ;;  %s1206_s7 = inlined_call_operand.hbm [shape: f32[2,128], index: 7, kind: output, shape index: {}]  }
   0x1   :  { %13 = vsyncpa [#allocation6], 0  ;;  %s36_s26 = sshll.u32 %s1202_s3, 4  ;;  %s37_s26 = int_to_ptr.hbm [resolvable:$true] %s36_s26 }
   0x2   :  { %14 = vsyncpa [#allocation4], 0  ;;  %s1054_s27 = smov [#allocation5]   ;;  %s21_s8 = sshll.u32 %s1200_s1, 4  ;;  %s22_s8 = int_to_ptr.hbm [resolvable:$true] %s21_s8 }
   0x3   :  { %s38_s28 = sshll.u32 %s1054_s27, 4  ;;  %s1055_s9 = smov 64   ;;  %s39_s28 = int_to_ptr.vmem [resolvable:$true] %s38_s28 }
   0x4   :  { %s1056_s10 = smov 4   ;;  %s1057_s11 = smov [#allocation2]  }
   0x5   :  { %44 = dma.hbm_to_vmem [thread:$0]  %s37_s26, 256, %s39_s28, [#allocation6], %s1055_s9, %s1055_s9, %s1056_s10  }
   0x6   :  { %s23_s12 = sshll.u32 %s1057_s11, 4  ;;  %s1058_s13 = smov 128   ;;  %s24_s12 = int_to_ptr.vmem [resolvable:$true] %s23_s12 }
   0x7   :  { %s1059_s3 = smov 8   ;;  %s51_s16 = sshll.u32 %s1204_s5, 4  ;;  %s52_s16 = int_to_ptr.hbm [resolvable:$true] %s51_s16 }
   0x8   :  { %29 = dma.hbm_to_vmem [thread:$0]  %s22_s8, 1024, %s24_s12, [#allocation3], %s1058_s13, %s1058_s13, %s1059_s3  }
   0x9   :  { %s1060_s17 = smov [#allocation7]  }
   0xa   :  { %s53_s18 = sshll.u32 %s1060_s17, 4  ;;  %s54_s18 = int_to_ptr.vmem [resolvable:$true] %s53_s18 }
   0xb   :  { %59 = dma.hbm_to_vmem [thread:$0]  %s52_s16, 1024, %s54_s18, [#allocation6], %s1055_s9, %s1055_s9, %s1056_s10  }
   0xc   :  { %1048 = dma.done.wait [#allocation3], 1024  }
   0xd   :  { %1049 = vsyncadd [#allocation3], 4294966272 }
   0xe   :  { %1050 = dma.done.wait [#allocation6], 1280  }
   0xf   :  { %1051 = vsyncadd [#allocation6], 4294966016  ;;  %v1061_v0 = vmov 0   ;;  %v75_v1 = vld [vmem:[%s1199_s0] sm:$0xff]  ;;  %v98_v2 = vld [vmem:[#allocation2 + $0x38] sm:$0xff]  ;;  %v77_v12 = vlaneseq  ;;  %vm99_vm0 = vcmask 523264  }
  0x10   :  { %884 = vset.pattern.permute.xlu0 %v1061_v0  ;;  %885 = vset.pattern.permute.xlu2 %v1061_v0  ;;  %v862_v3 = vld [vmem:[%s1201_s2 + $0x8] sm:$0xff]  ;;  %v97_v4 = vld [vmem:[#allocation2 + $0x30] sm:$0xff]  ;;  %v861_v6 = vld [vmem:[%s1201_s2] sm:$0xff]  ;;  %v1062_v15 = vmov 0.0   ;;  %s1063_s2 = smov 32   ;;  %vm145_vm6 = vcmask 261120  }
  0x11   :  { %80 = vperm.xlu0 %884, %v75_v1   ;;  %114 = vmatpush.msra.mxu0 %v98_v2  ;;  %v96_v5 = vld [vmem:[#allocation2 + $0x28] sm:$0xff]  ;;  %v95_v7 = vld [vmem:[#allocation2 + $0x20] sm:$0xff]  ;;  %v94_v8 = vld [vmem:[#allocation2 + $0x18] sm:$0xff]  ;;  %v1127_v13 = vand.u32 127, %v77_v12  ;;  %s1064_s28 = smov [#allocation8]  }
  0x12   :  { %155 = vmatpush.bf16.msra.mxu1 %v862_v3  ;;  %213 = vmatpush.bf16.msra.mxu2 %v862_v3  ;;  %v93_v9 = vld [vmem:[#allocation2 + $0x10] sm:$0xff]  ;;  %v92_v10 = vld [vmem:[#allocation2 + $0x8] sm:$0xff]  ;;  %v91_v11 = vld [vmem:[#allocation2] sm:$0xff]  ;;  %s780_s29 = sshll.u32 %s1064_s28, 4  ;;  %s781_s29 = int_to_ptr.vmem [resolvable:$true] %s780_s29 }
  0x13   :  { %115 = vmatpush.msra.mxu0 %v97_v4  ;;  %469 = vmatpush.bf16.msra.mxu3 %v862_v3 }
  0x15   :  { %116 = vmatpush.msra.mxu0 %v96_v5 }
  0x16   :  { %156 = vmatpush.bf16.msra.mxu1 %v861_v6  ;;  %214 = vmatpush.bf16.msra.mxu2 %v861_v6 }
  0x17   :  { %117 = vmatpush.msra.mxu0 %v95_v7  ;;  %470 = vmatpush.bf16.msra.mxu3 %v861_v6 }
  0x19   :  { %157 = vmatmul.bf16.vlgmr.msra.gmra.mxu1 %v1061_v0  ;;  %118 = vmatpush.msra.mxu0 %v94_v8 }
  0x1a   :  { %343 = vmatpush.bf16.msrb.mxu1 %v862_v3  ;;  %408 = vmatpush.bf16.msrb.mxu2 %v862_v3 }
  0x1b   :  { %119 = vmatpush.msra.mxu0 %v93_v9 }
  0x1d   :  { %120 = vmatpush.msra.mxu0 %v92_v10 }
  0x1e   :  { %344 = vmatpush.bf16.msrb.mxu1 %v861_v6  ;;  %409 = vmatpush.bf16.msrb.mxu2 %v861_v6 }
  0x1f   :  { %121 = vmatpush.msra.mxu0 %v91_v11 }
  0x21   :  { %278 = vmatpush.bf16.msrb.mxu0 %v862_v3 }
  0x22   :  { %599 = vmatpush.bf16.msra.mxu1 %v862_v3 }
  0x25   :  { %279 = vmatpush.bf16.msrb.mxu0 %v861_v6 }
  0x26   :  { %600 = vmatpush.bf16.msra.mxu1 %v861_v6 }
  0x83   :  { %v81_v14 = vpop.permute.xlu0 %80 }
  0x84   :  { %vm85_vm1 = vcmp.eq.s32.totalorder %v1127_v13, %v81_v14 }
  0x85   :  { %v793_v16 = vsel %vm85_vm1, 1.0, %v1062_v15 }
  0x86   :  { %795 = vmatmul.msk.f32.vlgmr.msra.gmra.mxu0 %vm99_vm0, %v793_v16 }
  0x87   :  { %534 = vmatpush.bf16.msra.mxu0 %v862_v3 }
  0x8b   :  { %535 = vmatpush.bf16.msra.mxu0 %v861_v6  ;;  %v76_v6 = vld [vmem:[%s1199_s0 + $0x8] sm:$0xff] }
  0x96   :  { %v158_v17 = vpop.f32.mrf.mxu1 }
  0x9e   :  { %v160_v18 = vpop.f32.mrf.mxu1 }
 0x103   :  { %v1132_v19 = vpop.f32.mrf.mxu0 }
 0x104   :  { %v162_v20 = vadd.f32 %v158_v17, %v1132_v19 }
 0x106   :  { %888 = vtanh.f32 %v162_v20  ;;  %v805_v22 = vmul.f32 -1.442695, %v162_v20 }
 0x108   :  { %890 = vpow2.f32 %v805_v22 }
 0x10c   :  { %v889_v21 = vpop.eup %888 }
 0x10d   :  { %185 = vrot.lane.b32.xlu0 %v889_v21, %s1055_s9 }
 0x10e   :  { %v891_v23 = vpop.eup %890 }
 0x10f   :  { %v166_v24 = vadd.f32 1.0, %v891_v23 }
 0x111   :  { %892 = vrcp.f32 %v166_v24  ;;  %v178_v30 = vand.u32 2147483648, %v166_v24  ;;  %vm172_vm3 = vweird.f32 %v166_v24  ;;  %v176_v31 = vand.u32 2147483647, %v166_v24 }
 0x113   :  { %v179_v33 = vor.u32 1.1754944e-38, %v178_v30  ;;  %vm177_vm5 = vcmp.eq.f32.partialorder %v176_v31, 8.507059e+37 }
 0x117   :  { %v893_v25 = vpop.eup %892 }
 0x118   :  { %v168_v26 = vmul.f32 %v893_v25, %v166_v24  ;;  %vm173_vm2 = vweird.f32 %v893_v25 }
 0x119   :  { %vm174_vm4 = vmor %vm172_vm3, %vm173_vm2 }
 0x11a   :  { %v169_v27 = vsub.f32 1.0, %v168_v26 }
 0x11c   :  { %v170_v28 = vmul.f32 %v893_v25, %v169_v27 }
 0x11e   :  { %v171_v29 = vadd.f32 %v893_v25, %v170_v28 }
 0x120   :  { %v175_v32 = vsel %vm174_vm4, %v893_v25, %v171_v29 }
 0x121   :  { %v180_v35 = vsel %vm177_vm5, %v179_v33, %v175_v32 }
 0x122   :  { %v183_v37 = vmul.f32 0.0, %v180_v35 }
 0x17f   :  { %v186_v34 = vpop.permute.xlu0 %185 }
 0x180   :  { %v188_v36 = vmul.f32 %v186_v34, %v180_v35 }
 0x182   :  { %190 = vrot.lane.b32.xlu1 %v188_v36, %s1063_s2 }
 0x1f4   :  { %v191_v38 = vpop.permute.xlu1 %190 }
 0x1f5   :  { %v193_v39 = vadd.f32 %v191_v38, %v183_v37 }
 0x1f7   :  { %894 = vtanh.f32 %v193_v39  ;;  %v245_v1 = vrot.slane %v193_v39, 6 }
 0x1fd   :  { %v895_v40 = vpop.eup %894 }
 0x1fe   :  { %196 = vrot.lane.b32.xlu1 %v895_v40, %s1055_s9 }
 0x270   :  { %v197_v41 = vpop.permute.xlu1 %196 }
 0x271   :  { %v199_v42 = vmul.f32 %v197_v41, %v180_v35 }
 0x273   :  { %v200_v43 = vpack.c.bf16 %v199_v42, %v199_v42 }
 0x275   :  { %202 = vrot.lane.b32.xlu2 %v200_v43, %s1063_s2 }
 0x2cf   :  { %v203_v44 = vpop.permute.xlu2 %202 }
 0x2d0   :  { %806 = vmatmul.msk.bf16.vlgmr.msra.gmra.mxu2 %vm145_vm6, %v203_v44 }
 0x353   :  { %v216_v45 = vpop.f32.mrf.mxu2 }
 0x354   :  { %v221_v46 = vrot.slane %v216_v45, 6 }
 0x356   :  { %v223_v47 = vadd.f32 %v221_v46, %v1132_v19 }
 0x358   :  { %896 = vtanh.f32 %v223_v47  ;;  %v807_v50 = vmul.f32 -1.442695, %v223_v47 }
 0x35a   :  { %898 = vpow2.f32 %v807_v50 }
 0x35b   :  { %v218_v48 = vpop.f32.mrf.mxu2 }
 0x35e   :  { %v897_v49 = vpop.eup %896 }
 0x35f   :  { %249 = vrot.lane.b32.xlu2 %v897_v49, %s1055_s9 }
 0x360   :  { %v899_v51 = vpop.eup %898 }
 0x361   :  { %v227_v52 = vadd.f32 1.0, %v899_v51 }
 0x363   :  { %900 = vrcp.f32 %v227_v52  ;;  %v239_v58 = vand.u32 2147483648, %v227_v52  ;;  %vm233_vm8 = vweird.f32 %v227_v52  ;;  %v237_v59 = vand.u32 2147483647, %v227_v52 }
 0x365   :  { %v240_v61 = vor.u32 1.1754944e-38, %v239_v58  ;;  %vm238_vm10 = vcmp.eq.f32.partialorder %v237_v59, 8.507059e+37 }
 0x367   :  { %83 = vperm.xlu2 %885, %v76_v6  }
 0x369   :  { %v901_v53 = vpop.eup %900 }
 0x36a   :  { %v229_v54 = vmul.f32 %v901_v53, %v227_v52  ;;  %vm234_vm7 = vweird.f32 %v901_v53 }
 0x36b   :  { %vm235_vm9 = vmor %vm233_vm8, %vm234_vm7 }
 0x36c   :  { %v230_v55 = vsub.f32 1.0, %v229_v54 }
 0x36e   :  { %v231_v56 = vmul.f32 %v901_v53, %v230_v55 }
 0x370   :  { %v232_v57 = vadd.f32 %v901_v53, %v231_v56 }
 0x372   :  { %v236_v60 = vsel %vm235_vm9, %v901_v53, %v232_v57 }
 0x373   :  { %v241_v63 = vsel %vm238_vm10, %v240_v61, %v236_v60 }
 0x374   :  { %v247_v2 = vmul.f32 %v245_v1, %v241_v63 }
 0x3b9   :  { %v250_v62 = vpop.permute.xlu2 %249 }
 0x3ba   :  { %v252_v0 = vmul.f32 %v250_v62, %v241_v63 }
 0x3bc   :  { %254 = vrot.lane.b32.xlu0 %v252_v0, %s1063_s2 }
 0x3c1   :  { %v84_v11 = vpop.permute.xlu2 %83 }
 0x3c2   :  { %vm86_vm11 = vcmp.eq.s32.totalorder %v1127_v13, %v84_v11 }
 0x3c3   :  { %v794_v12 = vsel %vm86_vm11, 1.0, %v1062_v15 }
 0x3c4   :  { %796 = vmatmul.msk.f32.gmra.mxu0 %vm99_vm0, %v794_v12 }
 0x42e   :  { %v255_v3 = vpop.permute.xlu0 %254 }
 0x42f   :  { %v257_v4 = vadd.f32 %v255_v3, %v247_v2 }
 0x431   :  { %902 = vtanh.f32 %v257_v4  ;;  %v310_v36 = vrot.slane %v257_v4, 6 }
 0x437   :  { %v903_v5 = vpop.eup %902 }
 0x438   :  { %260 = vrot.lane.b32.xlu1 %v903_v5, %s1055_s9 }
 0x441   :  { %v1152_v16 = vpop.f32.mrf.mxu0 }
 0x4aa   :  { %v261_v7 = vpop.permute.xlu1 %260 }
 0x4ab   :  { %v263_v8 = vmul.f32 %v261_v7, %v241_v63 }
 0x4ad   :  { %v264_v9 = vpack.c.bf16 %v263_v8, %v263_v8 }
 0x4af   :  { %v266_v10 = vrot.slane %v264_v9, 1 }
 0x4b1   :  { %267 = vrot.lane.b32.xlu0 %v266_v10, %s1063_s2 }
 0x523   :  { %v268_v14 = vpop.permute.xlu0 %267 }
 0x524   :  { %808 = vmatmul.msk.bf16.vlgmr.msrb.gmra.mxu0 %vm145_vm6, %v268_v14 }
 0x5a1   :  { %v281_v17 = vpop.f32.mrf.mxu0 }
 0x5a2   :  { %v286_v18 = vrot.slane %v281_v17, 4 }
 0x5a4   :  { %v288_v20 = vadd.f32 %v286_v18, %v1132_v19 }
 0x5a6   :  { %904 = vtanh.f32 %v288_v20  ;;  %v809_v23 = vmul.f32 -1.442695, %v288_v20 }
 0x5a8   :  { %906 = vpow2.f32 %v809_v23 }
 0x5a9   :  { %v283_v21 = vpop.f32.mrf.mxu0 }
 0x5ac   :  { %v905_v22 = vpop.eup %904 }
 0x5ad   :  { %314 = vrot.lane.b32.xlu1 %v905_v22, %s1055_s9 }
 0x5ae   :  { %v907_v13 = vpop.eup %906 }
 0x5af   :  { %v292_v15 = vadd.f32 1.0, %v907_v13 }
 0x5b1   :  { %908 = vrcp.f32 %v292_v15  ;;  %v304_v29 = vand.u32 2147483648, %v292_v15  ;;  %vm298_vm13 = vweird.f32 %v292_v15  ;;  %v302_v30 = vand.u32 2147483647, %v292_v15 }
 0x5b3   :  { %v305_v32 = vor.u32 1.1754944e-38, %v304_v29  ;;  %vm303_vm15 = vcmp.eq.f32.partialorder %v302_v30, 8.507059e+37 }
 0x5b7   :  { %v909_v24 = vpop.eup %908 }
 0x5b8   :  { %v294_v25 = vmul.f32 %v909_v24, %v292_v15  ;;  %vm299_vm12 = vweird.f32 %v909_v24 }
 0x5b9   :  { %vm300_vm14 = vmor %vm298_vm13, %vm299_vm12 }
 0x5ba   :  { %v295_v26 = vsub.f32 1.0, %v294_v25 }
 0x5bc   :  { %v296_v27 = vmul.f32 %v909_v24, %v295_v26 }
 0x5be   :  { %v297_v28 = vadd.f32 %v909_v24, %v296_v27 }
 0x5c0   :  { %v301_v31 = vsel %vm300_vm14, %v909_v24, %v297_v28 }
 0x5c1   :  { %v306_v34 = vsel %vm303_vm15, %v305_v32, %v301_v31 }
 0x5c2   :  { %v312_v37 = vmul.f32 %v310_v36, %v306_v34 }
 0x61f   :  { %v315_v33 = vpop.permute.xlu1 %314 }
 0x620   :  { %v317_v35 = vmul.f32 %v315_v33, %v306_v34 }
 0x622   :  { %319 = vrot.lane.b32.xlu2 %v317_v35, %s1063_s2 }
 0x67c   :  { %v320_v38 = vpop.permute.xlu2 %319 }
 0x67d   :  { %v322_v39 = vadd.f32 %v320_v38, %v312_v37 }
 0x67f   :  { %910 = vtanh.f32 %v322_v39  ;;  %v375_v1 = vrot.slane %v322_v39, 6 }
 0x685   :  { %v911_v40 = vpop.eup %910 }
 0x686   :  { %325 = vrot.lane.b32.xlu0 %v911_v40, %s1055_s9 }
 0x6f8   :  { %v326_v41 = vpop.permute.xlu0 %325 }
 0x6f9   :  { %v328_v42 = vmul.f32 %v326_v41, %v306_v34 }
 0x6fb   :  { %v329_v43 = vpack.c.bf16 %v328_v42, %v328_v42 }
 0x6fd   :  { %v331_v44 = vrot.slane %v329_v43, 2 }
 0x6ff   :  { %332 = vrot.lane.b32.xlu1 %v331_v44, %s1063_s2 }
 0x771   :  { %v333_v45 = vpop.permute.xlu1 %332 }
 0x772   :  { %810 = vmatmul.msk.bf16.vlgmr.msrb.gmra.mxu1 %vm145_vm6, %v333_v45 }
 0x7ef   :  { %v346_v46 = vpop.f32.mrf.mxu1 }
 0x7f0   :  { %v351_v47 = vrot.slane %v346_v46, 2 }
 0x7f2   :  { %v353_v48 = vadd.f32 %v351_v47, %v1132_v19 }
 0x7f4   :  { %912 = vtanh.f32 %v353_v48  ;;  %v811_v51 = vmul.f32 -1.442695, %v353_v48 }
 0x7f6   :  { %914 = vpow2.f32 %v811_v51 }
 0x7f7   :  { %v348_v49 = vpop.f32.mrf.mxu1 }
 0x7fa   :  { %v913_v50 = vpop.eup %912 }
 0x7fb   :  { %379 = vrot.lane.b32.xlu2 %v913_v50, %s1055_s9 }
 0x7fc   :  { %v915_v52 = vpop.eup %914 }
 0x7fd   :  { %v357_v53 = vadd.f32 1.0, %v915_v52 }
 0x7ff   :  { %916 = vrcp.f32 %v357_v53  ;;  %v369_v59 = vand.u32 2147483648, %v357_v53  ;;  %vm363_vm1 = vweird.f32 %v357_v53  ;;  %v367_v60 = vand.u32 2147483647, %v357_v53 }
 0x801   :  { %v370_v61 = vor.u32 1.1754944e-38, %v369_v59  ;;  %vm368_vm3 = vcmp.eq.f32.partialorder %v367_v60, 8.507059e+37 }
 0x805   :  { %v917_v54 = vpop.eup %916 }
 0x806   :  { %v359_v55 = vmul.f32 %v917_v54, %v357_v53  ;;  %vm364_vm0 = vweird.f32 %v917_v54 }
 0x807   :  { %vm365_vm2 = vmor %vm363_vm1, %vm364_vm0 }
 0x808   :  { %v360_v56 = vsub.f32 1.0, %v359_v55 }
 0x80a   :  { %v361_v57 = vmul.f32 %v917_v54, %v360_v56 }
 0x80c   :  { %v362_v58 = vadd.f32 %v917_v54, %v361_v57 }
 0x80e   :  { %v366_v19 = vsel %vm365_vm2, %v917_v54, %v362_v58 }
 0x80f   :  { %v371_v63 = vsel %vm368_vm3, %v370_v61, %v366_v19 }
 0x810   :  { %v377_v2 = vmul.f32 %v375_v1, %v371_v63 }
 0x855   :  { %v380_v62 = vpop.permute.xlu2 %379 }
 0x856   :  { %v382_v0 = vmul.f32 %v380_v62, %v371_v63 }
 0x858   :  { %384 = vrot.lane.b32.xlu0 %v382_v0, %s1063_s2 }
 0x8ca   :  { %v385_v3 = vpop.permute.xlu0 %384 }
 0x8cb   :  { %v387_v4 = vadd.f32 %v385_v3, %v377_v2 }
 0x8cd   :  { %918 = vtanh.f32 %v387_v4  ;;  %v437_v32 = vrot.slane %v387_v4, 6 }
 0x8d3   :  { %v919_v5 = vpop.eup %918 }
 0x8d4   :  { %390 = vrot.lane.b32.xlu1 %v919_v5, %s1055_s9 }
 0x946   :  { %v391_v6 = vpop.permute.xlu1 %390 }
 0x947   :  { %v393_v7 = vmul.f32 %v391_v6, %v371_v63 }
 0x949   :  { %v394_v8 = vpack.c.bf16 %v393_v7, %v393_v7 }
 0x94b   :  { %v396_v9 = vrot.slane %v394_v8, 3 }
 0x94d   :  { %397 = vrot.lane.b32.xlu2 %v396_v9, %s1063_s2 }
 0x9a7   :  { %v398_v10 = vpop.permute.xlu2 %397 }
 0x9a8   :  { %812 = vmatmul.msk.bf16.vlgmr.msrb.gmra.mxu2 %vm145_vm6, %v398_v10 }
 0xa2b   :  { %v411_v11 = vpop.f32.mrf.mxu2 }
 0xa2c   :  { %v415_v12 = vadd.f32 %v411_v11, %v1152_v16 }
 0xa2e   :  { %920 = vtanh.f32 %v415_v12  ;;  %v813_v18 = vmul.f32 -1.442695, %v415_v12 }
 0xa30   :  { %922 = vpow2.f32 %v813_v18 }
 0xa33   :  { %v413_v14 = vpop.f32.mrf.mxu2 }
 0xa34   :  { %v921_v17 = vpop.eup %920 }
 0xa35   :  { %441 = vrot.lane.b32.xlu0 %v921_v17, %s1055_s9 }
 0xa36   :  { %v923_v20 = vpop.eup %922 }
 0xa37   :  { %v419_v21 = vadd.f32 1.0, %v923_v20 }
 0xa39   :  { %924 = vrcp.f32 %v419_v21  ;;  %v431_v25 = vand.u32 2147483648, %v419_v21  ;;  %vm425_vm5 = vweird.f32 %v419_v21  ;;  %v429_v26 = vand.u32 2147483647, %v419_v21 }
 0xa3b   :  { %v432_v28 = vor.u32 1.1754944e-38, %v431_v25  ;;  %vm430_vm8 = vcmp.eq.f32.partialorder %v429_v26, 8.507059e+37 }
 0xa3f   :  { %v925_v22 = vpop.eup %924 }
 0xa40   :  { %v421_v23 = vmul.f32 %v925_v22, %v419_v21  ;;  %vm426_vm4 = vweird.f32 %v925_v22 }
 0xa41   :  { %vm427_vm7 = vmor %vm425_vm5, %vm426_vm4 }
 0xa42   :  { %v422_v13 = vsub.f32 1.0, %v421_v23 }
 0xa44   :  { %v423_v15 = vmul.f32 %v925_v22, %v422_v13 }
 0xa46   :  { %v424_v24 = vadd.f32 %v925_v22, %v423_v15 }
 0xa48   :  { %v428_v27 = vsel %vm427_vm7, %v925_v22, %v424_v24 }
 0xa49   :  { %v433_v30 = vsel %vm430_vm8, %v432_v28, %v428_v27 }
 0xa4a   :  { %v439_v33 = vmul.f32 %v437_v32, %v433_v30 }
 0xaa7   :  { %v442_v29 = vpop.permute.xlu0 %441 }
 0xaa8   :  { %v444_v31 = vmul.f32 %v442_v29, %v433_v30 }
 0xaaa   :  { %446 = vrot.lane.b32.xlu1 %v444_v31, %s1063_s2 }
 0xb1c   :  { %v447_v34 = vpop.permute.xlu1 %446 }
 0xb1d   :  { %v449_v35 = vadd.f32 %v447_v34, %v439_v33 }
 0xb1f   :  { %926 = vtanh.f32 %v449_v35  ;;  %v501_v19 = vrot.slane %v449_v35, 6 }
 0xb25   :  { %v927_v36 = vpop.eup %926 }
 0xb26   :  { %452 = vrot.lane.b32.xlu2 %v927_v36, %s1055_s9 }
 0xb80   :  { %v453_v37 = vpop.permute.xlu2 %452 }
 0xb81   :  { %v455_v38 = vmul.f32 %v453_v37, %v433_v30 }
 0xb83   :  { %v456_v39 = vpack.c.bf16 %v455_v38, %v455_v38 }
 0xb85   :  { %458 = vrot.lane.b32.xlu0 %v456_v39, %s1063_s2 }
 0xbf7   :  { %v459_v40 = vpop.permute.xlu0 %458 }
 0xbf8   :  { %814 = vmatmul.msk.bf16.vlgmr.msra.gmra.mxu3 %vm145_vm6, %v459_v40 }
 0xc7b   :  { %v472_v41 = vpop.f32.mrf.mxu3 }
 0xc7c   :  { %v477_v42 = vrot.slane %v472_v41, 6 }
 0xc7e   :  { %v479_v43 = vadd.f32 %v477_v42, %v1152_v16 }
 0xc80   :  { %928 = vtanh.f32 %v479_v43  ;;  %v815_v46 = vmul.f32 -1.442695, %v479_v43 }
 0xc82   :  { %930 = vpow2.f32 %v815_v46 }
 0xc83   :  { %v474_v44 = vpop.f32.mrf.mxu3 }
 0xc86   :  { %v929_v45 = vpop.eup %928 }
 0xc87   :  { %505 = vrot.lane.b32.xlu1 %v929_v45, %s1055_s9 }
 0xc88   :  { %v931_v47 = vpop.eup %930 }
 0xc89   :  { %v483_v48 = vadd.f32 1.0, %v931_v47 }
 0xc8b   :  { %932 = vrcp.f32 %v483_v48  ;;  %v495_v54 = vand.u32 2147483648, %v483_v48  ;;  %vm489_vm10 = vweird.f32 %v483_v48  ;;  %v493_v55 = vand.u32 2147483647, %v483_v48 }
 0xc8d   :  { %v496_v57 = vor.u32 1.1754944e-38, %v495_v54  ;;  %vm494_vm12 = vcmp.eq.f32.partialorder %v493_v55, 8.507059e+37 }
 0xc91   :  { %v933_v49 = vpop.eup %932 }
 0xc92   :  { %v485_v50 = vmul.f32 %v933_v49, %v483_v48  ;;  %vm490_vm9 = vweird.f32 %v933_v49 }
 0xc93   :  { %vm491_vm11 = vmor %vm489_vm10, %vm490_vm9 }
 0xc94   :  { %v486_v51 = vsub.f32 1.0, %v485_v50 }
 0xc96   :  { %v487_v52 = vmul.f32 %v933_v49, %v486_v51 }
 0xc98   :  { %v488_v53 = vadd.f32 %v933_v49, %v487_v52 }
 0xc9a   :  { %v492_v56 = vsel %vm491_vm11, %v933_v49, %v488_v53 }
 0xc9b   :  { %v497_v59 = vsel %vm494_vm12, %v496_v57, %v492_v56 }
 0xc9c   :  { %v503_v61 = vmul.f32 %v501_v19, %v497_v59 }
 0xcf9   :  { %v506_v58 = vpop.permute.xlu1 %505 }
 0xcfa   :  { %v508_v60 = vmul.f32 %v506_v58, %v497_v59 }
 0xcfc   :  { %510 = vrot.lane.b32.xlu2 %v508_v60, %s1063_s2 }
 0xd56   :  { %v511_v62 = vpop.permute.xlu2 %510 }
 0xd57   :  { %v513_v63 = vadd.f32 %v511_v62, %v503_v61  ;;  %v864_v61 = vld [vmem:[#allocation5 + $0x8] sm:$0xff]  ;;  %v863_v62 = vld [vmem:[#allocation5] sm:$0xff] }
 0xd58   :  { %684 = vmatpush.bf16.msra.mxu2 %v864_v61 }
 0xd59   :  { %934 = vtanh.f32 %v513_v63  ;;  %v566_v28 = vrot.slane %v513_v63, 6 }
 0xd5c   :  { %685 = vmatpush.bf16.msra.mxu2 %v863_v62 }
 0xd5f   :  { %v935_v0 = vpop.eup %934 }
 0xd60   :  { %516 = vrot.lane.b32.xlu0 %v935_v0, %s1055_s9 }
 0xdd2   :  { %v517_v1 = vpop.permute.xlu0 %516 }
 0xdd3   :  { %v519_v2 = vmul.f32 %v517_v1, %v497_v59 }
 0xdd5   :  { %v520_v3 = vpack.c.bf16 %v519_v2, %v519_v2 }
 0xdd7   :  { %v522_v4 = vrot.slane %v520_v3, 1  ;;  %v872_v3 = vld [vmem:[#allocation7 + $0x38] sm:$0xff] }
 0xdd8   :  { %761 = vmatpush.bf16.msrb.mxu3 %v872_v3 }
 0xdd9   :  { %523 = vrot.lane.b32.xlu1 %v522_v4, %s1063_s2  ;;  %v871_v4 = vld [vmem:[#allocation7 + $0x30] sm:$0xff] }
 0xddc   :  { %762 = vmatpush.bf16.msrb.mxu3 %v871_v4 }
 0xe4b   :  { %v524_v5 = vpop.permute.xlu1 %523 }
 0xe4c   :  { %816 = vmatmul.msk.bf16.vlgmr.msra.gmra.mxu0 %vm145_vm6, %v524_v5  ;;  %v870_v5 = vld [vmem:[#allocation7 + $0x28] sm:$0xff] }
 0xe4d   :  { %763 = vmatpush.bf16.msrb.mxu3 %v870_v5 }
 0xec9   :  { %v537_v6 = vpop.f32.mrf.mxu0 }
 0xeca   :  { %v542_v7 = vrot.slane %v537_v6, 4  ;;  %v869_v6 = vld [vmem:[#allocation7 + $0x20] sm:$0xff] }
 0xecb   :  { %764 = vmatpush.bf16.msrb.mxu3 %v869_v6 }
 0xecc   :  { %v544_v8 = vadd.f32 %v542_v7, %v1152_v16  ;;  %v868_v7 = vld [vmem:[#allocation7 + $0x18] sm:$0xff] }
 0xece   :  { %936 = vtanh.f32 %v544_v8  ;;  %v817_v11 = vmul.f32 -1.442695, %v544_v8  ;;  %v867_v8 = vld [vmem:[#allocation7 + $0x10] sm:$0xff] }
 0xecf   :  { %765 = vmatpush.bf16.msrb.mxu3 %v868_v7 }
 0xed0   :  { %938 = vpow2.f32 %v817_v11  ;;  %v865_v11 = vld [vmem:[#allocation7] sm:$0xff] }
 0xed1   :  { %v539_v9 = vpop.f32.mrf.mxu0 }
 0xed3   :  { %766 = vmatpush.bf16.msrb.mxu3 %v867_v8 }
 0xed4   :  { %v937_v10 = vpop.eup %936 }
 0xed5   :  { %570 = vrot.lane.b32.xlu2 %v937_v10, %s1055_s9  ;;  %v866_v10 = vld [vmem:[#allocation7 + $0x8] sm:$0xff] }
 0xed6   :  { %v939_v12 = vpop.eup %938 }
 0xed7   :  { %v548_v14 = vadd.f32 1.0, %v939_v12  ;;  %767 = vmatpush.bf16.msrb.mxu3 %v866_v10  ;;  %v886_v12 = vld [vmem:[%s1203_s4] ss:$0 sm:$0xff] }
 0xed9   :  { %940 = vrcp.f32 %v548_v14  ;;  %v560_v23 = vand.u32 2147483648, %v548_v14  ;;  %vm554_vm14 = vweird.f32 %v548_v14  ;;  %v558_v13 = vand.u32 2147483647, %v548_v14 }
 0xedb   :  { %v561_v24 = vor.u32 1.1754944e-38, %v560_v23  ;;  %vm559_vm0 = vcmp.eq.f32.partialorder %v558_v13, 8.507059e+37  ;;  %768 = vmatpush.bf16.msrb.mxu3 %v865_v11 }
 0xedf   :  { %v941_v17 = vpop.eup %940 }
 0xee0   :  { %v550_v18 = vmul.f32 %v941_v17, %v548_v14  ;;  %vm555_vm13 = vweird.f32 %v941_v17 }
 0xee1   :  { %vm556_vm15 = vmor %vm554_vm14, %vm555_vm13 }
 0xee2   :  { %v551_v20 = vsub.f32 1.0, %v550_v18 }
 0xee4   :  { %v552_v21 = vmul.f32 %v941_v17, %v551_v20 }
 0xee6   :  { %v553_v22 = vadd.f32 %v941_v17, %v552_v21 }
 0xee8   :  { %v557_v15 = vsel %vm556_vm15, %v941_v17, %v553_v22  ;;  %v887_v22 = vld [vmem:[%s1205_s6] ss:$0 sm:$0xff] }
 0xee9   :  { %v562_v26 = vsel %vm559_vm0, %v561_v24, %v557_v15 }
 0xeea   :  { %v568_v29 = vmul.f32 %v566_v28, %v562_v26 }
 0xf2f   :  { %v571_v25 = vpop.permute.xlu2 %570 }
 0xf30   :  { %v573_v27 = vmul.f32 %v571_v25, %v562_v26 }
 0xf32   :  { %575 = vrot.lane.b32.xlu0 %v573_v27, %s1063_s2 }
 0xfa4   :  { %v576_v30 = vpop.permute.xlu0 %575 }
 0xfa5   :  { %v578_v31 = vadd.f32 %v576_v30, %v568_v29 }
 0xfa7   :  { %942 = vtanh.f32 %v578_v31  ;;  %v631_v57 = vrot.slane %v578_v31, 6 }
 0xfad   :  { %v943_v32 = vpop.eup %942 }
 0xfae   :  { %581 = vrot.lane.b32.xlu1 %v943_v32, %s1055_s9 }
0x1020   :  { %v582_v33 = vpop.permute.xlu1 %581 }
0x1021   :  { %v584_v34 = vmul.f32 %v582_v33, %v562_v26 }
0x1023   :  { %v585_v35 = vpack.c.bf16 %v584_v34, %v584_v34 }
0x1025   :  { %v587_v36 = vrot.slane %v585_v35, 2 }
0x1027   :  { %588 = vrot.lane.b32.xlu2 %v587_v36, %s1063_s2 }
0x1081   :  { %v589_v37 = vpop.permute.xlu2 %588 }
0x1082   :  { %818 = vmatmul.msk.bf16.vlgmr.msra.gmra.mxu1 %vm145_vm6, %v589_v37 }
0x10ff   :  { %v602_v38 = vpop.f32.mrf.mxu1 }
0x1100   :  { %v607_v39 = vrot.slane %v602_v38, 2 }
0x1102   :  { %v609_v40 = vadd.f32 %v607_v39, %v1152_v16 }
0x1104   :  { %944 = vtanh.f32 %v609_v40  ;;  %v819_v43 = vmul.f32 -1.442695, %v609_v40 }
0x1106   :  { %946 = vpow2.f32 %v819_v43 }
0x1107   :  { %v604_v41 = vpop.f32.mrf.mxu1 }
0x110a   :  { %v945_v42 = vpop.eup %944 }
0x110b   :  { %635 = vrot.lane.b32.xlu0 %v945_v42, %s1055_s9 }
0x110c   :  { %v947_v44 = vpop.eup %946 }
0x110d   :  { %v613_v45 = vadd.f32 1.0, %v947_v44 }
0x110f   :  { %948 = vrcp.f32 %v613_v45  ;;  %v625_v51 = vand.u32 2147483648, %v613_v45  ;;  %vm619_vm2 = vweird.f32 %v613_v45  ;;  %v623_v52 = vand.u32 2147483647, %v613_v45 }
0x1111   :  { %v626_v53 = vor.u32 1.1754944e-38, %v625_v51  ;;  %vm624_vm4 = vcmp.eq.f32.partialorder %v623_v52, 8.507059e+37 }
0x1115   :  { %v949_v46 = vpop.eup %948 }
0x1116   :  { %v615_v47 = vmul.f32 %v949_v46, %v613_v45  ;;  %vm620_vm1 = vweird.f32 %v949_v46 }
0x1117   :  { %vm621_vm3 = vmor %vm619_vm2, %vm620_vm1 }
0x1118   :  { %v616_v48 = vsub.f32 1.0, %v615_v47 }
0x111a   :  { %v617_v49 = vmul.f32 %v949_v46, %v616_v48 }
0x111c   :  { %v618_v50 = vadd.f32 %v949_v46, %v617_v49 }
0x111e   :  { %v622_v16 = vsel %vm621_vm3, %v949_v46, %v618_v50 }
0x111f   :  { %v627_v55 = vsel %vm624_vm4, %v626_v53, %v622_v16 }
0x1120   :  { %v633_v58 = vmul.f32 %v631_v57, %v627_v55 }
0x117d   :  { %v636_v54 = vpop.permute.xlu0 %635 }
0x117e   :  { %v638_v56 = vmul.f32 %v636_v54, %v627_v55 }
0x1180   :  { %640 = vrot.lane.b32.xlu1 %v638_v56, %s1063_s2 }
0x11f2   :  { %v641_v59 = vpop.permute.xlu1 %640 }
0x11f3   :  { %v643_v60 = vadd.f32 %v641_v59, %v633_v58 }
0x11f5   :  { %950 = vtanh.f32 %v643_v60 }
0x11fb   :  { %v951_v19 = vpop.eup %950 }
0x11fc   :  { %646 = vrot.lane.b32.xlu2 %v951_v19, %s1055_s9  ;;  %s782_s9 = sshll.u32 %s1206_s7, 4  ;;  %s783_s9 = int_to_ptr.hbm [resolvable:$true] %s782_s9 }
0x1256   :  { %v647_v63 = vpop.permute.xlu2 %646 }
0x1257   :  { %v649_v0 = vmul.f32 %v647_v63, %v627_v55 }
0x1259   :  { %v650_v1 = vpack.c.bf16 %v649_v0, %v649_v0 }
0x125b   :  { %v660_v2 = vrot.slane %v650_v1, 3 }
0x125d   :  { %661 = vrot.lane.b32.xlu0 %v660_v2, %s1063_s2 }
0x12cf   :  { %v662_v9 = vpop.permute.xlu0 %661 }
0x12d0   :  { %828 = vmatmul.msk.bf16.vlgmr.msra.gmra.mxu2 %vm145_vm6, %v662_v9 }
0x1353   :  { %v687_v14 = vpop.f32.mrf.mxu2 }
0x1354   :  { %v688_v17 = vadd.f32 %v886_v12, %v687_v14 }
0x1356   :  { %v691_v18 = vmax.f32 %v688_v17, 0.0 }
0x1358   :  { %v692_v20 = vpack.c.bf16 %v691_v18, %v691_v18 }
0x135a   :  { %769 = vmatmul.bf16.vlgmr.msrb.gmra.mxu3 %v692_v20 }
0x135b   :  { %v689_v21 = vpop.f32.mrf.mxu2 }
0x13dd   :  { %v770_v23 = vpop.f32.mrf.mxu3 }
0x13de   :  { %v771_v13 = vadd.f32 %v887_v22, %v770_v23 }
0x13e0   :  { %774 = vst [vmem:[#allocation8] sm:$0x3] %v771_v13 }
0x13e1   :  { %785 = dma.vmem_to_hbm [thread:$0]  %s781_s29, 32, %s783_s9, [#allocation4]  }
0x13e5   :  { %v772_v15 = vpop.f32.mrf.mxu3 }
0x13e6   :  { %1052 = dma.done.wait [#allocation4], 32  }
0x13e7   :  { %1053 = vsyncadd [#allocation4], 4294967264 }
0x13e8   :  { %790 = vsyncpa [#allocation3], 1 }
0x13e9   :  { %791 = vsyncpa [#allocation6], 1 }
0x13ea   :  { %792 = vsyncpa [#allocation4], 1 }

</bundles_post_ra>
